<compile_context>
chip_gen: v7x
topology: tpu7x:2x2x1
jax: 0.10.0
libtpu: 0.0.40
codegen_flags: <defaults>
</compile_context>

<pallas_src>
import jax
import jax.numpy as jnp
from jax.experimental import pallas as pl
from jax.experimental.pallas import tpu as pltpu


def approx_posterior_kernel(x_ref, eps_ref, w1_ref, b1_ref, w2_ref, b2_ref,
                            wh_ref, bh_ref, out_ref):
    wdt = w1_ref.dtype          # matmul operand dtype (f32 or bf16); f32 accum

    x = x_ref[...]

    # --- representation MLP: Linear -> ReLU -> Linear -> ReLU ---
    # (dropout p=0.2 is identity in inference mode)
    h = jnp.dot(x.astype(wdt), w1_ref[...], preferred_element_type=jnp.float32)
    h = jnp.maximum(h + b1_ref[...], 0.0)
    rep = jnp.dot(h.astype(wdt), w2_ref[...], preferred_element_type=jnp.float32)
    rep = jnp.maximum(rep + b2_ref[...], 0.0)          # outer ReLU

    # --- fused mu|cov head: single MXU push at 2*state_size lane width ---
    heads_raw = (jnp.dot(rep.astype(wdt), wh_ref[...],
                         preferred_element_type=jnp.float32) + bh_ref[...])

    d = wh_ref.shape[-1] // 2                           # state_size (static)
    # Lane-masked softplus on the cov half: VPU select on data already in
    # registers, no slice+concat cross-lane shuffle.
    lane = jax.lax.broadcasted_iota(jnp.int32, heads_raw.shape, 1)
    heads = jnp.where(lane < d, heads_raw, jnp.logaddexp(heads_raw, 0.0))

    mu = heads[:, :d]
    std = jnp.sqrt(heads[:, d:])                        # cov > 0 -> sqrt safe

    # --- reparameterized sample on the streamed lane-dense noise slab ---
    eps = eps_ref[...]
    s = eps.shape[-1] // d                              # sample_size (static)
    # NOTE: jnp.tile along lanes is a whole-vreg copy only when d % 128 == 0;
    # at small d it is an XLU lane shuffle (negligible at these widths).
    sample = eps * jnp.tile(std, (1, s)) + jnp.tile(mu, (1, s))

    # --- single fused, lane-dense (128-multiple) output store ---
    pad = out_ref.shape[-1] - heads.shape[-1] - sample.shape[-1]
    pieces = [heads, sample]
    if pad:                                             # static Python int
        pieces.append(jnp.zeros((heads.shape[0], pad), jnp.float32))
    out_ref[...] = jnp.concatenate(pieces, axis=-1)


def _round_up(v, m):
    return ((v + m - 1) // m) * m


def _vmem_budget_bytes():
    """Generation-aware scoped-VMEM budget (half of physical, clamped)."""
    try:
        phys = pltpu.get_tpu_info().vmem_capacity_bytes
    except Exception:
        phys = 128 * 1024 * 1024          # v5e/v6e physical; safe fallback
    return int(min(max(phys // 2, 32 * 1024 * 1024), 96 * 1024 * 1024))


def _pick_batch_tile(batch, input_dim, h1, h2, head_dim, samp_dim, out_width,
                     weight_bytes, vmem_budget_bytes):
    """Largest batch tile whose working set fits the budget.

    Counts double-buffered tiled I/O (x, eps, fused output slab) plus the
    live single-buffered intermediates (h, rep, heads, sample) per row, and
    the (double-buffered) resident weights once.  No artificial row cap: at
    these widths the kernel is per-step-overhead / DMA-bound, so fewer and
    larger grid iterations win.
    """
    io_row = 2 * 4 * (input_dim + samp_dim + out_width)          # 2x buffered
    act_row = 4 * (h1 + h2 + 2 * head_dim + samp_dim + out_width)
    per_row = io_row + act_row
    avail = max(vmem_budget_bytes - 2 * weight_bytes, per_row * 8)
    tb = min(batch, max(8, avail // per_row))
    return max(8, (tb // 8) * 8)                                 # sublane mult


def approx_posterior_forward(x, params, *, sample_size, rng_key,
                             block_batch=None, compute_dtype=jnp.float32):
    """x: [batch, input_dim] f32.  Returns ((mu, cov), sample)."""
    batch, input_dim = x.shape
    h1 = params["w1"].shape[1]
    h2 = params["w2"].shape[1]
    head_dim = params["wh"].shape[1]                   # 2 * state_size
    state_size = head_dim // 2
    samp_dim = sample_size * state_size
    out_width = _round_up(head_dim + samp_dim, 128)    # lane-dense fused slab

    # Matmul operands in compute_dtype (bf16 for production widths); biases
    # and all elementwise math stay f32.
    w1 = params["w1"].astype(compute_dtype)
    w2 = params["w2"].astype(compute_dtype)
    wh = params["wh"].astype(compute_dtype)
    b1, b2, bh = params["b1"], params["b2"], params["bh"]

    weight_bytes = 4 * (input_dim * h1 + h1 + h1 * h2 + h2
                        + h2 * head_dim + head_dim)
    vmem_budget = _vmem_budget_bytes()

    if block_batch is None:
        block_batch = _pick_batch_tile(batch, input_dim, h1, h2, head_dim,
                                       samp_dim, out_width, weight_bytes,
                                       vmem_budget)
    tb = max(8, (min(block_batch, max(batch, 8)) // 8) * 8)
    nb = pl.cdiv(batch, tb)
    padded_batch = nb * tb

    # Reparameterization noise: generated once in the wrapper (deterministic,
    # grid-invariant) and streamed as a lane-dense [B, S*D] slab.
    eps = jax.random.normal(rng_key, (batch, samp_dim), jnp.float32)

    if padded_batch != batch:
        pad_rows = padded_batch - batch
        x_in = jnp.pad(x, ((0, pad_rows), (0, 0)))
        eps_in = jnp.pad(eps, ((0, pad_rows), (0, 0)))
    else:
        x_in, eps_in = x, eps

    def tiled(shape):        # batch-tiled operands
        return pl.BlockSpec(shape, lambda i: (i, 0))

    def resident(shape):     # weights: constant index_map -> VMEM-resident
        return pl.BlockSpec(shape, lambda i: (0, 0))

    grid_spec = pltpu.PrefetchScalarGridSpec(
        num_scalar_prefetch=0,
        grid=(nb,),
        in_specs=[
            tiled((tb, input_dim)),                    # x
            tiled((tb, samp_dim)),                     # eps (lane-dense noise)
            resident((input_dim, h1)),                 # w1
            resident((1, h1)),                         # b1
            resident((h1, h2)),                        # w2
            resident((1, h2)),                         # b2
            resident((h2, head_dim)),                  # wh (mu|cov fused)
            resident((1, head_dim)),                   # bh
        ],
        out_specs=tiled((tb, out_width)),              # mu|cov|sample|pad slab
    )

    flops = (2 * padded_batch * (input_dim * h1 + h1 * h2 + h2 * head_dim)
             + padded_batch * (2 * head_dim + 3 * samp_dim))
    trans = padded_batch * state_size * 3              # softplus(~2 EUP)+sqrt
    bytes_acc = (4 * padded_batch * (input_dim + samp_dim + out_width)
                 + weight_bytes)

    out = pl.pallas_call(
        approx_posterior_kernel,
        out_shape=jax.ShapeDtypeStruct((padded_batch, out_width), jnp.float32),
        grid_spec=grid_spec,
        compiler_params=pltpu.CompilerParams(
            # "parallel" batch axis; on v7x switch to pltpu.CORE_PARALLEL (or
            # pl.core_map) to guarantee both TensorCores are used.
            dimension_semantics=("parallel",),
            vmem_limit_bytes=vmem_budget,
        ),
        cost_estimate=pl.CostEstimate(
            flops=flops, transcendentals=trans, bytes_accessed=bytes_acc),
    )(x_in, eps_in, w1, b1, w2, b2, wh, bh)

    mu = out[:batch, :state_size]
    cov = out[:batch, state_size:head_dim]
    sample = out[:batch, head_dim:head_dim + samp_dim].reshape(
        batch, sample_size, state_size)
    return (mu, cov), sample


def init_params(key, input_dim, mlp_sizes, state_size):
    """Deterministic synthetic init (uniform, PyTorch-Linear-style bounds).

    Weights stored as [in, out] (transpose of nn.Linear) so the kernel computes
    x @ W + b.  The mu/cov heads are fused once at init into wh/bh.
    """
    def linear(key, fan_in, fan_out):
        k_w, k_b = jax.random.split(key)
        bound = 1.0 / jnp.sqrt(float(fan_in))
        w = jax.random.uniform(k_w, (fan_in, fan_out), jnp.float32, -bound, bound)
        b = jax.random.uniform(k_b, (1, fan_out), jnp.float32, -bound, bound)
        return w, b

    k1, k2, k3, k4 = jax.random.split(key, 4)
    w1, b1 = linear(k1, input_dim, mlp_sizes[0])
    w2, b2 = linear(k2, mlp_sizes[0], mlp_sizes[1])
    wmu, bmu = linear(k3, mlp_sizes[1], state_size)
    wcov, bcov = linear(k4, mlp_sizes[1], state_size)
    wh = jnp.concatenate([wmu, wcov], axis=1)          # [hidden, 2*state_size]
    bh = jnp.concatenate([bmu, bcov], axis=1)          # [1, 2*state_size]
    return dict(w1=w1, b1=b1, w2=w2, b2=b2, wh=wh, bh=bh)


if __name__ == "__main__":
    # Small config consistent with the module.
    batch = 16
    input_dim = 16
    mlp_sizes = [32, 32]
    state_dims = [8, 8]          # state_size = sum(state_dims) = 16
    sample_size = 4
    state_size = sum(state_dims)

    key = jax.random.PRNGKey(0)
    k_params, k_x, k_eps = jax.random.split(key, 3)

    params = init_params(k_params, input_dim, mlp_sizes, state_size)
    x = jax.random.normal(k_x, (batch, input_dim), jnp.float32)

    # block_batch=8 -> grid=(2,): exercises the pipelined / parallel batch grid.
    (mu, cov), sample = approx_posterior_forward(
        x, params, sample_size=sample_size, rng_key=k_eps, block_batch=8)
    jax.block_until_ready((mu, cov, sample))

    # --- full reference check (pure JAX, f32), including the sample ---
    h = jnp.maximum(x @ params["w1"] + params["b1"], 0.0)
    rep = jnp.maximum(h @ params["w2"] + params["b2"], 0.0)
    heads_ref = rep @ params["wh"] + params["bh"]
    mu_ref = heads_ref[:, :state_size]
    cov_ref = jax.nn.softplus(heads_ref[:, state_size:])
    eps_ref = jax.random.normal(
        k_eps, (batch, sample_size * state_size), jnp.float32
    ).reshape(batch, sample_size, state_size)
    sample_ref = eps_ref * jnp.sqrt(cov_ref)[:, None, :] + mu_ref[:, None, :]

    assert mu.shape == (batch, state_size)
    assert cov.shape == (batch, state_size)
    assert sample.shape == (batch, sample_size, state_size)
    assert jnp.allclose(mu, mu_ref, atol=1e-4)
    assert jnp.allclose(cov, cov_ref, atol=1e-4)
    assert jnp.allclose(sample, sample_ref, atol=1e-4)
    assert bool(jnp.all(cov > 0.0))
    assert bool(jnp.all(jnp.isfinite(sample)))

    print("KERNEL_OK")
</pallas_src>

<mosaic_0001>
module attributes {stable_mosaic.version = 11 : i64} {
  func.func @approx_posterior_kernel(%arg0: i32, %arg1: memref<8x16xf32, #tpu.memory_space<vmem>>, %arg2: memref<8x64xf32, #tpu.memory_space<vmem>>, %arg3: memref<16x32xf32, #tpu.memory_space<vmem>>, %arg4: memref<1x32xf32, #tpu.memory_space<vmem>>, %arg5: memref<32x32xf32, #tpu.memory_space<vmem>>, %arg6: memref<1x32xf32, #tpu.memory_space<vmem>>, %arg7: memref<32x32xf32, #tpu.memory_space<vmem>>, %arg8: memref<1x32xf32, #tpu.memory_space<vmem>>, %arg9: memref<8x128xf32, #tpu.memory_space<vmem>>) attributes {dimension_semantics = [#tpu.dimension_semantics<parallel>], iteration_bounds = array<i64: 2>, scalar_prefetch = 0 : i64, scratch_operands = 0 : i64, tpu.core_type = #tpu.core_type<tc>, window_params = [{transform_indices = @transform_0, window_bounds = array<i64: 8, 16>}, {transform_indices = @transform_1, window_bounds = array<i64: 8, 64>}, {pipeline_mode = #tpu.pipeline_mode<synchronous>, transform_indices = @transform_2, window_bounds = array<i64: 16, 32>}, {pipeline_mode = #tpu.pipeline_mode<synchronous>, transform_indices = @transform_3, window_bounds = array<i64: 1, 32>}, {pipeline_mode = #tpu.pipeline_mode<synchronous>, transform_indices = @transform_4, window_bounds = array<i64: 32, 32>}, {pipeline_mode = #tpu.pipeline_mode<synchronous>, transform_indices = @transform_5, window_bounds = array<i64: 1, 32>}, {pipeline_mode = #tpu.pipeline_mode<synchronous>, transform_indices = @transform_6, window_bounds = array<i64: 32, 32>}, {pipeline_mode = #tpu.pipeline_mode<synchronous>, transform_indices = @transform_7, window_bounds = array<i64: 1, 32>}, {transform_indices = @transform_8, window_bounds = array<i64: 8, 128>}]} {
    %c0 = arith.constant 0 : index
    %c0_0 = arith.constant 0 : index
    %0 = vector.load %arg1[%c0, %c0_0] : memref<8x16xf32, #tpu.memory_space<vmem>>, vector<8x16xf32>
    %c0_1 = arith.constant 0 : index
    %c0_2 = arith.constant 0 : index
    %1 = vector.load %arg3[%c0_1, %c0_2] : memref<16x32xf32, #tpu.memory_space<vmem>>, vector<16x32xf32>
    %cst = arith.constant dense<0.000000e+00> : vector<8x32xf32>
    %2 = tpu.matmul %0, %1, %cst {dimension_numbers = #tpu.dot_dimension_numbers<[1], [0], [0], [1], [0, 0, 1, 1], [], []>} : vector<8x16xf32>, vector<16x32xf32>, vector<8x32xf32> -> vector<8x32xf32>
    %c0_3 = arith.constant 0 : index
    %c0_4 = arith.constant 0 : index
    %3 = vector.load %arg4[%c0_3, %c0_4] : memref<1x32xf32, #tpu.memory_space<vmem>>, vector<1x32xf32>
    %4 = vector.broadcast %3 : vector<1x32xf32> to vector<8x32xf32>
    %5 = arith.addf %2, %4 : vector<8x32xf32>
    %cst_5 = arith.constant 0.000000e+00 : f32
    %6 = vector.broadcast %cst_5 : f32 to vector<8x32xf32>
    %7 = arith.maximumf %5, %6 : vector<8x32xf32>
    %c0_6 = arith.constant 0 : index
    %c0_7 = arith.constant 0 : index
    %8 = vector.load %arg5[%c0_6, %c0_7] : memref<32x32xf32, #tpu.memory_space<vmem>>, vector<32x32xf32>
    %cst_8 = arith.constant dense<0.000000e+00> : vector<8x32xf32>
    %9 = tpu.matmul %7, %8, %cst_8 {dimension_numbers = #tpu.dot_dimension_numbers<[1], [0], [0], [1], [0, 0, 1, 1], [], []>} : vector<8x32xf32>, vector<32x32xf32>, vector<8x32xf32> -> vector<8x32xf32>
    %c0_9 = arith.constant 0 : index
    %c0_10 = arith.constant 0 : index
    %10 = vector.load %arg6[%c0_9, %c0_10] : memref<1x32xf32, #tpu.memory_space<vmem>>, vector<1x32xf32>
    %11 = vector.broadcast %10 : vector<1x32xf32> to vector<8x32xf32>
    %12 = arith.addf %9, %11 : vector<8x32xf32>
    %cst_11 = arith.constant 0.000000e+00 : f32
    %13 = vector.broadcast %cst_11 : f32 to vector<8x32xf32>
    %14 = arith.maximumf %12, %13 : vector<8x32xf32>
    %c0_12 = arith.constant 0 : index
    %c0_13 = arith.constant 0 : index
    %15 = vector.load %arg7[%c0_12, %c0_13] : memref<32x32xf32, #tpu.memory_space<vmem>>, vector<32x32xf32>
    %cst_14 = arith.constant dense<0.000000e+00> : vector<8x32xf32>
    %16 = tpu.matmul %14, %15, %cst_14 {dimension_numbers = #tpu.dot_dimension_numbers<[1], [0], [0], [1], [0, 0, 1, 1], [], []>} : vector<8x32xf32>, vector<32x32xf32>, vector<8x32xf32> -> vector<8x32xf32>
    %c0_15 = arith.constant 0 : index
    %c0_16 = arith.constant 0 : index
    %17 = vector.load %arg8[%c0_15, %c0_16] : memref<1x32xf32, #tpu.memory_space<vmem>>, vector<1x32xf32>
    %18 = vector.broadcast %17 : vector<1x32xf32> to vector<8x32xf32>
    %19 = arith.addf %16, %18 : vector<8x32xf32>
    %20 = tpu.iota {dimensions = array<i32: 1>} : vector<8x32xi32>
    %c16_i32 = arith.constant 16 : i32
    %21 = vector.broadcast %c16_i32 : i32 to vector<8x32xi32>
    %22 = arith.cmpi slt, %20, %21 : vector<8x32xi32>
    %cst_17 = arith.constant 0.000000e+00 : f32
    %23 = vector.broadcast %cst_17 : f32 to vector<8x32xf32>
    %24 = arith.maximumf %19, %23 : vector<8x32xf32>
    %25 = vector.broadcast %cst_17 : f32 to vector<8x32xf32>
    %26 = arith.subf %19, %25 : vector<8x32xf32>
    %27 = arith.cmpf one, %26, %26 : vector<8x32xf32>
    %28 = vector.broadcast %cst_17 : f32 to vector<8x32xf32>
    %29 = arith.addf %19, %28 : vector<8x32xf32>
    %30 = math.absf %26 : vector<8x32xf32>
    %cst_18 = arith.constant 0.000000e+00 : f32
    %31 = vector.broadcast %cst_18 : f32 to vector<8x32xf32>
    %32 = arith.subf %31, %30 : vector<8x32xf32>
    %33 = math.exp %32 : vector<8x32xf32>
    %34 = math.log1p %33 : vector<8x32xf32>
    %35 = arith.addf %24, %34 : vector<8x32xf32>
    %36 = arith.select %27, %29, %35 : vector<8x32xi1>, vector<8x32xf32>
    %37 = arith.select %22, %19, %36 : vector<8x32xi1>, vector<8x32xf32>
    %38 = vector.extract_strided_slice %37 {offsets = [0, 0], sizes = [8, 16], strides = [1, 1]} : vector<8x32xf32> to vector<8x16xf32>
    %39 = vector.extract_strided_slice %37 {offsets = [0, 16], sizes = [8, 16], strides = [1, 1]} : vector<8x32xf32> to vector<8x16xf32>
    %40 = math.sqrt %39 : vector<8x16xf32>
    %c0_19 = arith.constant 0 : index
    %c0_20 = arith.constant 0 : index
    %41 = vector.load %arg2[%c0_19, %c0_20] : memref<8x64xf32, #tpu.memory_space<vmem>>, vector<8x64xf32>
    %42 = tpu.concatenate %40, %40, %40, %40 in 1 : vector<8x16xf32>, vector<8x16xf32>, vector<8x16xf32>, vector<8x16xf32> -> vector<8x64xf32>
    %43 = arith.mulf %41, %42 : vector<8x64xf32>
    %44 = tpu.concatenate %38, %38, %38, %38 in 1 : vector<8x16xf32>, vector<8x16xf32>, vector<8x16xf32>, vector<8x16xf32> -> vector<8x64xf32>
    %45 = arith.addf %43, %44 : vector<8x64xf32>
    %cst_21 = arith.constant 0.000000e+00 : f32
    %46 = vector.broadcast %cst_21 : f32 to vector<8x32xf32>
    %47 = tpu.concatenate %37, %45, %46 in 1 : vector<8x32xf32>, vector<8x64xf32>, vector<8x32xf32> -> vector<8x128xf32>
    %c0_22 = arith.constant 0 : index
    %c0_23 = arith.constant 0 : index
    %48 = vector.load %arg9[%c0_22, %c0_23] : memref<8x128xf32, #tpu.memory_space<vmem>>, vector<8x128xf32>
    tpu.vector_store %arg9[%c0_22, %c0_23], %47 {strides = array<i32>} : memref<8x128xf32, #tpu.memory_space<vmem>>, vector<8x128xf32>,
    return
  }
  func.func @transform_0(%arg0: i32) -> (i32, i32) {
    %c0_i32 = arith.constant 0 : i32
    %c0_i32_0 = arith.constant 0 : i32
    return %arg0, %c0_i32 : i32, i32
  }
  func.func @transform_1(%arg0: i32) -> (i32, i32) {
    %c0_i32 = arith.constant 0 : i32
    %c0_i32_0 = arith.constant 0 : i32
    return %arg0, %c0_i32 : i32, i32
  }
  func.func @transform_2(%arg0: i32) -> (i32, i32) {
    %c0_i32 = arith.constant 0 : i32
    %c0_i32_0 = arith.constant 0 : i32
    %c0_i32_1 = arith.constant 0 : i32
    return %c0_i32, %c0_i32_0 : i32, i32
  }
  func.func @transform_3(%arg0: i32) -> (i32, i32) {
    %c0_i32 = arith.constant 0 : i32
    %c0_i32_0 = arith.constant 0 : i32
    %c0_i32_1 = arith.constant 0 : i32
    return %c0_i32, %c0_i32_0 : i32, i32
  }
  func.func @transform_4(%arg0: i32) -> (i32, i32) {
    %c0_i32 = arith.constant 0 : i32
    %c0_i32_0 = arith.constant 0 : i32
    %c0_i32_1 = arith.constant 0 : i32
    return %c0_i32, %c0_i32_0 : i32, i32
  }
  func.func @transform_5(%arg0: i32) -> (i32, i32) {
    %c0_i32 = arith.constant 0 : i32
    %c0_i32_0 = arith.constant 0 : i32
    %c0_i32_1 = arith.constant 0 : i32
    return %c0_i32, %c0_i32_0 : i32, i32
  }
  func.func @transform_6(%arg0: i32) -> (i32, i32) {
    %c0_i32 = arith.constant 0 : i32
    %c0_i32_0 = arith.constant 0 : i32
    %c0_i32_1 = arith.constant 0 : i32
    return %c0_i32, %c0_i32_0 : i32, i32
  }
  func.func @transform_7(%arg0: i32) -> (i32, i32) {
    %c0_i32 = arith.constant 0 : i32
    %c0_i32_0 = arith.constant 0 : i32
    %c0_i32_1 = arith.constant 0 : i32
    return %c0_i32, %c0_i32_0 : i32, i32
  }
  func.func @transform_8(%arg0: i32) -> (i32, i32) {
    %c0_i32 = arith.constant 0 : i32
    %c0_i32_0 = arith.constant 0 : i32
    return %arg0, %c0_i32 : i32, i32
  }
}

</mosaic_0001>

<bundles_post_ra>
// kernel: tpu_custom_call.1
= control target key start
LH: loop header
LB: loop body
LE: loop exit
PB: predicated region body
PF: predicated region fallthrough
CT: control target
= control target key end

     0   :  { %s1910_s0 = inlined_call_operand.hbm [shape: f32[16,16], index: 0, kind: input, shape index: {}]   ;;  %s1911_s1 = inlined_call_operand.hbm [shape: f32[16,64], index: 1, kind: input, shape index: {}]   ;;  %s1912_s2 = inlined_call_operand.hbm [shape: f32[16,32], index: 2, kind: input, shape index: {}]   ;;  %s1913_s3 = inlined_call_operand.hbm [shape: f32[1,32], index: 3, kind: input, shape index: {}]   ;;  %s1914_s4 = inlined_call_operand.hbm [shape: f32[32,32], index: 4, kind: input, shape index: {}]   ;;  %s1915_s5 = inlined_call_operand.hbm [shape: f32[1,32], index: 5, kind: input, shape index: {}]   ;;  %s1916_s6 = inlined_call_operand.hbm [shape: f32[32,32], index: 6, kind: input, shape index: {}]   ;;  %s1917_s7 = inlined_call_operand.hbm [shape: f32[1,32], index: 7, kind: input, shape index: {}]   ;;  %s1918_s8 = inlined_call_operand.hbm [shape: f32[16,128], index: 8, kind: output, shape index: {}]  }
   0x1   :  { %1925 = sst [smem:[#allocation24_spill]] %s1912_s2 }
   0x2   :  { %1926 = sst [smem:[#allocation25_spill]] %s1913_s3 }
   0x3   :  { %1927 = sst [smem:[#allocation26_spill]] %s1914_s4 }
   0x4   :  { %1928 = sst [smem:[#allocation27_spill]] %s1915_s5 }
   0x5   :  { %1929 = sst [smem:[#allocation28_spill]] %s1916_s6 }
   0x6   :  { %13 = vsyncpa [#allocation3], 0 }
   0x7   :  { %15 = vsyncpa [#allocation3 + $0x1], 0 }
   0x8   :  { %16 = vsyncpa [#allocation6], 0 }
   0x9   :  { %18 = vsyncpa [#allocation6 + $0x1], 0 }
   0xa   :  { %19 = vsyncpa [#allocation9], 0 }
   0xb   :  { %20 = vsyncpa [#allocation12], 0 }
   0xc   :  { %21 = vsyncpa [#allocation15], 0 }
   0xd   :  { %22 = vsyncpa [#allocation4], 0 }
   0xe   :  { %24 = vsyncpa [#allocation4 + $0x1], 0  ;;  %s1521_s27 = smov 0   ;;  %s1523_s28 = smov 0  }
   0xf   :  { %s1525_s29 = smov 0   ;;  %s1527_s30 = smov 0  }
  0x10 LB: > { %s1458_s9 = smov [#allocation7]   ;;  %s1542_s11 = sadd.s32 4294967295, %s1456_s30   ;;  %s1456_s30 = sphi %s1527_s30, %s1961_s30   ;;  %s1452_s29 = sphi %s1525_s29, %s1960_s29   ;;  %s1448_s28 = sphi %s1523_s28, %s1959_s28   ;;  %s1444_s27 = sphi %s1521_s27, %s1958_s27  }
  0x11   : > { %s251_s10 = sshll.u32 %s1458_s9, 4  ;;  %p926_p0 = scmp.ge.s32.totalorder %s1456_s30, 1  ;;  %s1547_s10 = int_to_ptr.vmem [resolvable:$true] %s251_s10 }
  0x12   : > { %p1921_p1 = scmp.eq.s32.totalorder %s1542_s11, 0  ;;  %p239_p2 = scmp.lt.s32.totalorder %s1456_s30, 3 }
  0x13   : > { %s1459_s13 = smov [#allocation8]   ;;  %s1460_s16 = smov [#allocation11]  }
  0x14   : > { %p1549_p3 = pnand %p926_p0, %p239_p2  ;;  %s265_s14 = sshll.u32 %s1459_s13, 4  ;;  %s1562_s14 = int_to_ptr.vmem [resolvable:$true] %s265_s14 }
  0x15   : > { %s289_s17 = sshll.u32 %s1460_s16, 4  ;;  %s1932_s2 = sld [smem:[#allocation24_spill]]  ;;  %s1564_s17 = int_to_ptr.vmem [resolvable:$true] %s289_s17 }
  0x16   : > { %s1930_s12 = scalar_select %p1549_p3, 1, 0 }
  0x17   : > { %p1045_p5 = pneg %p1549_p3 }
  0x19   : > { %p1558_p6 = pnand %p1045_p5, %p1921_p1 }
  0x1b   : > { %s1142_s20 = scalar_lea.hbm %s1932_s2, 256  ;;  %p1574_p8 = pneg %p1558_p6 }
  0x1c   : > { %p1143_p7 = scmp.ne.s32.totalorder %s1932_s2, %s1142_s20  ;;  %p1149_p11 = scmp.lt.u32.totalorder %s1142_s20, %s1932_s2 }
  0x1e   : > { %p1145_p9 = pnand %p1574_p8, %p1143_p7 }
  0x20   : > { %p1146_p10 = pneg %p1145_p9 }
  0x22   : > { %p1151_p12 = pnand %p1149_p11, %p1146_p10 }
  0x24   : > { %1154 = shalt.err (!%p1151_p12)
}
  0x25   : > { %s1155_s26 = scalar_lea.vmem %s1547_s10, 256  ;;  %p1163_p5 = scmp.lt.s32.totalorder %s1547_s10, %s1547_s10 }
  0x26   : > { %p1156_p13 = scmp.ne.s32.totalorder %s1547_s10, %s1155_s26  ;;  %p1164_p4 = scmp.lt.s32.totalorder %s1155_s26, %s1155_s26 }
  0x28   : > { %p1158_p0 = pnand %p1156_p13, %p1574_p8  ;;  %p1165_p7 = por %p1164_p4, %p1163_p5 }
  0x2a   : > { %p1159_p2 = pneg %p1158_p0 }
  0x2c   : > { %p1166_p9 = pnand %p1165_p7, %p1159_p2 }
  0x2e   : > { %1169 = shalt.err (!%p1166_p9)
}
  0x2f   : > { %s1919_s9 = smov 128   ;;  %s1462_s13 = smov 8  }
  0x30   : > { %1048 = dma.hbm_to_vmem [thread:$0]  (!%p1558_p6), %s1932_s2, 256, %s1547_s10, [#allocation6], %s1919_s9, %s1919_s9, %s1462_s13  }
  0x31   : > { %s1934_s3 = sld [smem:[#allocation25_spill]] }
  0x37   : > { %s1170_s21 = scalar_lea.hbm %s1934_s3, 16 }
  0x38   : > { %p1171_p4 = scmp.ne.s32.totalorder %s1934_s3, %s1170_s21  ;;  %p1177_p12 = scmp.lt.u32.totalorder %s1170_s21, %s1934_s3 }
  0x3a   : > { %p1173_p10 = pnand %p1171_p4, %p1574_p8 }
  0x3c   : > { %p1174_p11 = pneg %p1173_p10 }
  0x3e   : > { %p1179_p13 = pnand %p1177_p12, %p1174_p11 }
  0x40   : > { %1182 = shalt.err (!%p1179_p13)
}
  0x41   : > { %s1183_s10 = scalar_lea.vmem %s1562_s14, 16  ;;  %s1190_s16 = scalar_lea.vmem %s1562_s14, 32 }
  0x42   : > { %p1184_p0 = scmp.ne.s32.totalorder %s1562_s14, %s1183_s10  ;;  %p1191_p7 = scmp.lt.s32.totalorder %s1562_s14, %s1562_s14 }
  0x43   : > { %p1192_p9 = scmp.lt.s32.totalorder %s1190_s16, %s1183_s10 }
  0x44   : > { %p1186_p2 = pnand %p1184_p0, %p1574_p8 }
  0x45   : > { %p1193_p4 = por %p1192_p9, %p1191_p7 }
  0x46   : > { %p1187_p5 = pneg %p1186_p2 }
  0x48   : > { %p1194_p10 = pnand %p1193_p4, %p1187_p5 }
  0x4a   : > { %1197 = shalt.err (!%p1194_p10)
}
  0x4b   : > { %1051 = dma.hbm_to_vmem [thread:$0]  (!%p1558_p6), %s1934_s3, 16, %s1562_s14, [#allocation9]  }
  0x4c   : > { %s1935_s5 = sld [smem:[#allocation27_spill]] }
  0x52   : > { %s1198_s22 = scalar_lea.hbm %s1935_s5, 16 }
  0x53   : > { %p1199_p11 = scmp.ne.s32.totalorder %s1935_s5, %s1198_s22  ;;  %p1205_p0 = scmp.lt.u32.totalorder %s1198_s22, %s1935_s5 }
  0x55   : > { %p1201_p12 = pnand %p1199_p11, %p1574_p8 }
  0x57   : > { %p1202_p13 = pneg %p1201_p12 }
  0x59   : > { %p1207_p2 = pnand %p1205_p0, %p1202_p13 }
  0x5b   : > { %1210 = shalt.err (!%p1207_p2)
}
  0x5c   : > { %s1211_s14 = scalar_lea.vmem %s1564_s17, 16  ;;  %s1218_s16 = scalar_lea.vmem %s1564_s17, 32 }
  0x5d   : > { %p1212_p5 = scmp.ne.s32.totalorder %s1564_s17, %s1211_s14  ;;  %p1219_p4 = scmp.lt.s32.totalorder %s1564_s17, %s1564_s17 }
  0x5e   : > { %p1220_p10 = scmp.lt.s32.totalorder %s1218_s16, %s1211_s14 }
  0x5f   : > { %p1214_p7 = pnand %p1212_p5, %p1574_p8 }
  0x60   : > { %p1221_p11 = por %p1220_p10, %p1219_p4 }
  0x61   : > { %p1215_p9 = pneg %p1214_p7 }
  0x63   : > { %p1222_p12 = pnand %p1221_p11, %p1215_p9 }
  0x65   : > { %1225 = shalt.err (!%p1222_p12)
}
  0x66   : > { %1057 = dma.hbm_to_vmem [thread:$0]  (!%p1558_p6), %s1935_s5, 16, %s1564_s17, [#allocation12]  }
  0x67   : > { %s1463_s20 = smov [#allocation10]   ;;  %s1464_s22 = smov [#allocation13]  }
  0x68   : > { %s275_s21 = sshll.u32 %s1463_s20, 4  ;;  %s299_s24 = sshll.u32 %s1464_s22, 4  ;;  %s276_s21 = int_to_ptr.vmem [resolvable:$true] %s275_s21  ;;  %s300_s24 = int_to_ptr.vmem [resolvable:$true] %s299_s24 }
  0x69   : > { %s1936_s4 = sld [smem:[#allocation26_spill]] }
  0x6f   : > { %s1226_s10 = scalar_lea.hbm %s1936_s4, 512 }
  0x70   : > { %p1227_p13 = scmp.ne.s32.totalorder %s1936_s4, %s1226_s10  ;;  %p1233_p5 = scmp.lt.u32.totalorder %s1226_s10, %s1936_s4 }
  0x72   : > { %p1229_p0 = pnand %p1227_p13, %p1574_p8 }
  0x74   : > { %p1230_p2 = pneg %p1229_p0 }
  0x76   : > { %p1235_p7 = pnand %p1233_p5, %p1230_p2 }
  0x78   : > { %1238 = shalt.err (!%p1235_p7)
}
  0x79   : > { %s1239_s17 = scalar_lea.vmem %s276_s21, 512  ;;  %p1247_p11 = scmp.lt.s32.totalorder %s276_s21, %s276_s21 }
  0x7a   : > { %p1240_p9 = scmp.ne.s32.totalorder %s276_s21, %s1239_s17  ;;  %p1248_p12 = scmp.lt.s32.totalorder %s1239_s17, %s1239_s17 }
  0x7c   : > { %p1242_p4 = pnand %p1240_p9, %p1574_p8  ;;  %p1249_p1 = por %p1248_p12, %p1247_p11 }
  0x7e   : > { %p1243_p10 = pneg %p1242_p4 }
  0x80   : > { %p1250_p3 = pnand %p1249_p1, %p1243_p10 }
  0x82   : > { %1253 = shalt.err (!%p1250_p3)
}
  0x83   : > { %s1937_s19 = smov 128   ;;  %s1938_s6 = sld [smem:[#allocation28_spill]] }
  0x84   : > { %1054 = dma.hbm_to_vmem [thread:$0]  (!%p1558_p6), %s1936_s4, 512, %s276_s21, [#allocation9], %s1937_s19, %s1937_s19, %s1462_s13  }
  0x89   : > { %s1254_s26 = scalar_lea.hbm %s1938_s6, 512 }
  0x8a   : > { %p1255_p1 = scmp.ne.s32.totalorder %s1938_s6, %s1254_s26  ;;  %p1261_p0 = scmp.lt.u32.totalorder %s1254_s26, %s1938_s6 }
  0x8c   : > { %p1257_p3 = pnand %p1255_p1, %p1574_p8 }
  0x8e   : > { %p1258_p13 = pneg %p1257_p3 }
  0x90   : > { %p1263_p2 = pnand %p1261_p0, %p1258_p13 }
  0x92   : > { %1266 = shalt.err (!%p1263_p2)
}
  0x93   : > { %s1267_s17 = scalar_lea.vmem %s300_s24, 512  ;;  %p1275_p4 = scmp.lt.s32.totalorder %s300_s24, %s300_s24 }
  0x94   : > { %p1268_p5 = scmp.ne.s32.totalorder %s300_s24, %s1267_s17  ;;  %p1276_p10 = scmp.lt.s32.totalorder %s1267_s17, %s1267_s17 }
  0x96   : > { %p1270_p7 = pnand %p1268_p5, %p1574_p8  ;;  %p1277_p11 = por %p1276_p10, %p1275_p4 }
  0x98   : > { %p1271_p9 = pneg %p1270_p7 }
  0x9a   : > { %p1278_p12 = pnand %p1277_p11, %p1271_p9 }
  0x9c   : > { %1281 = shalt.err (!%p1278_p12)
}
  0x9d   : > { %1060 = dma.hbm_to_vmem [thread:$0]  (!%p1558_p6), %s1938_s6, 512, %s300_s24, [#allocation12], %s1937_s19, %s1937_s19, %s1462_s13  }
  0x9e   : > { %s1465_s20 = smov [#allocation14]   ;;  %s1282_s10 = scalar_lea.hbm %s1917_s7, 16 }
  0x9f   : > { %s313_s22 = sshll.u32 %s1465_s20, 4  ;;  %p1283_p1 = scmp.ne.s32.totalorder %s1917_s7, %s1282_s10  ;;  %s314_s22 = int_to_ptr.vmem [resolvable:$true] %s313_s22 }
  0xa0   : > { %p1289_p0 = scmp.lt.u32.totalorder %s1282_s10, %s1917_s7 }
  0xa1   : > { %p1285_p3 = pnand %p1283_p1, %p1574_p8 }
  0xa3   : > { %p1286_p13 = pneg %p1285_p3 }
  0xa5   : > { %p1291_p2 = pnand %p1289_p0, %p1286_p13 }
  0xa7   : > { %1294 = shalt.err (!%p1291_p2)
}
  0xa8   : > { %s1295_s13 = scalar_lea.vmem %s314_s22, 16  ;;  %s1302_s24 = scalar_lea.vmem %s314_s22, 32 }
  0xa9   : > { %p1296_p5 = scmp.ne.s32.totalorder %s314_s22, %s1295_s13  ;;  %p1303_p4 = scmp.lt.s32.totalorder %s314_s22, %s314_s22 }
  0xaa   : > { %p1304_p10 = scmp.lt.s32.totalorder %s1302_s24, %s1295_s13 }
  0xab   : > { %p1298_p7 = pnand %p1296_p5, %p1574_p8 }
  0xac   : > { %p1305_p11 = por %p1304_p10, %p1303_p4 }
  0xad   : > { %p1299_p9 = pneg %p1298_p7 }
  0xaf   : > { %p1306_p12 = pnand %p1305_p11, %p1299_p9 }
  0xb1   : > { %1309 = shalt.err (!%p1306_p12)
}
  0xb2   : > { %1063 = dma.hbm_to_vmem [thread:$0]  (!%p1558_p6), %s1917_s7, 16, %s314_s22, [#allocation15]  }
  0xb3   : > { %s925_s23 = sadd.s32 4294967294, %s1456_s30   ;;  %s1708_s15 = sadd.s32 1, %s1456_s30  }
  0xb4   : > { %s34_s9 = ssub.s32 %s1456_s30, %s1708_s15  ;;  %s37_s20 = sadd.s32 1, %s1452_s29 }
  0xb5   : > { %p35_p8 = scmp.eq.s32.totalorder %s34_s9, 0  ;;  %p44_p1 = scmp.ne.s32.totalorder %s1452_s29, %s1448_s28 }
  0xb6   : > { %p45_p3 = scmp.eq.s32.totalorder %s1456_s30, 0  ;;  %p50_p13 = scmp.ne.s32.totalorder %s1448_s28, %s1444_s27 }
  0xb7   : > { %s1719_s25 = scalar_select %p35_p8, %s1452_s29, %s37_s20  }
  0xb8   : > { %p1721_p0 = por %p45_p3, %p44_p1  ;;  %p1940_p2 = scmp.eq.s32.totalorder %s1542_s11, 0 }
  0xb9   : > { %p226_p5 = scmp.eq.s32.totalorder %s1542_s11, 1  ;;  %p232_p7 = scmp.eq.s32.totalorder %s925_s23, 1 }
  0xba   : > { %p1727_p6 = por %p1940_p2, %p50_p13  ;;  %p1081_p9 = scmp.lt.s32.totalorder %s1456_s30, 2 }
  0xbb   : > { %s324_s10 = sand.u32 1, %s1452_s29   ;;  %p1734_p4 = por %p226_p5, %p44_p1 }
  0xbc   : > { %s1941_s22 = scalar_select %p1727_p6, 1, 0 }
  0xbd   : > { %s1942_s14 = scalar_select %p1734_p4, 1, 0 }
  0xbe   : > { %p1738_p10 = por %p232_p7, %p50_p13  ;;  %s1742_s18 = sshll.u32 %s324_s10, 3 }
  0xbf   : > { %s935_s17 = sshll.u32 %s1456_s30, 7  ;;  %s328_s21 = scalar_lea.vmem [#allocation2], %s1742_s18 }
  0xc0   : > { %s1943_s16 = scalar_select %p1738_p10, 1, 0 }
  0xc1   : > { %s1748_s19 = scalar_lea.hbm %s1910_s0, %s935_s17  ;;  %s335_s23 = sshll.u32 %s328_s21, 4  ;;  %s1751_s23 = int_to_ptr.vmem [resolvable:$true] %s335_s23 }
  0xc2   : > { %p1755_p11 = pnand %p1081_p9, %p1721_p0  ;;  %s1762_s13 = scalar_lea.hbm %s1911_s1, %s935_s17 }
  0xc3   : > { %s342_s24 = sand.u32 1, %s1456_s30   ;;  %s325_s3 = scalar_lea.sflag [#allocation3], %s324_s10 }
  0xc4   : > { %s1310_s4 = scalar_lea.hbm %s1748_s19, 128  ;;  %p1312_p8 = pneg %p1755_p11 }
  0xc5   : > { %p1311_p12 = scmp.ne.s32.totalorder %s1748_s19, %s1310_s4  ;;  %s1315_s5 = scalar_lea.hbm %s1910_s0, 256 }
  0xc6   : > { %p1316_p13 = scmp.lt.u32.totalorder %s1748_s19, %s1910_s0  ;;  %p1317_p0 = scmp.lt.u32.totalorder %s1315_s5, %s1310_s4 }
  0xc7   : > { %p1313_p1 = pnand %p1312_p8, %p1311_p12  ;;  %p1319_p5 = scmp.lt.u32.totalorder %s1310_s4, %s1748_s19 }
  0xc8   : > { %p1318_p2 = por %p1317_p0, %p1316_p13 }
  0xc9   : > { %p1314_p3 = pneg %p1313_p1 }
  0xca   : > { %p1320_p7 = por %p1319_p5, %p1318_p2 }
  0xcc   : > { %p1321_p9 = pnand %p1320_p7, %p1314_p3 }
  0xce   : > { %1324 = shalt.err (!%p1321_p9)
}
  0xcf   : > { %s1325_s10 = scalar_lea.vmem %s1751_s23, 128  ;;  %s1466_s17 = smov [#allocation2]  }
  0xd0   : > { %p1326_p12 = scmp.ne.s32.totalorder %s1751_s23, %s1325_s10  ;;  %s1330_s20 = sshll.u32 %s1466_s17, 4  ;;  %s1331_s20 = int_to_ptr.vmem [resolvable:$false] %s1330_s20 }
  0xd1   : > { %s1332_s6 = scalar_lea.vmem %s1331_s20, 256  ;;  %p1333_p4 = scmp.lt.s32.totalorder %s1751_s23, %s1331_s20 }
  0xd2   : > { %p1328_p1 = pnand %p1326_p12, %p1312_p8  ;;  %p1334_p13 = scmp.lt.s32.totalorder %s1332_s6, %s1325_s10 }
  0xd4   : > { %p1329_p10 = pneg %p1328_p1  ;;  %p1335_p0 = por %p1334_p13, %p1333_p4 }
  0xd6   : > { %p1336_p2 = pnand %p1335_p0, %p1329_p10 }
  0xd8   : > { %1339 = shalt.err (!%p1336_p2)
}
  0xd9   : > { %1067 = dma.hbm_to_vmem [thread:$0]  (!%p1755_p11), %s1748_s19, 128, %s1751_s23, %s325_s3  }
  0xda   : > { %s346_s4 = scalar_lea.vmem [#allocation5], %s1742_s18  ;;  %s343_s26 = scalar_lea.sflag [#allocation6], %s342_s24 }
  0xdb   : > { %s353_s5 = sshll.u32 %s346_s4, 4  ;;  %s1340_s21 = scalar_lea.hbm %s1762_s13, 128  ;;  %s354_s5 = int_to_ptr.vmem [resolvable:$true] %s353_s5 }
  0xdc   : > { %p1341_p4 = scmp.ne.s32.totalorder %s1762_s13, %s1340_s21  ;;  %s1345_s17 = scalar_lea.hbm %s1911_s1, 256 }
  0xdd   : > { %p1346_p5 = scmp.lt.u32.totalorder %s1762_s13, %s1911_s1  ;;  %p1347_p7 = scmp.lt.u32.totalorder %s1345_s17, %s1340_s21 }
  0xde   : > { %p1343_p10 = pnand %p1341_p4, %p1312_p8  ;;  %p1349_p12 = scmp.lt.u32.totalorder %s1340_s21, %s1762_s13 }
  0xdf   : > { %p1348_p9 = por %p1347_p7, %p1346_p5 }
  0xe0   : > { %p1344_p3 = pneg %p1343_p10 }
  0xe1   : > { %p1350_p1 = por %p1349_p12, %p1348_p9 }
  0xe3   : > { %p1351_p13 = pnand %p1350_p1, %p1344_p3 }
  0xe5   : > { %1354 = shalt.err (!%p1351_p13)
}
  0xe6   : > { %s1355_s3 = scalar_lea.vmem %s354_s5, 128  ;;  %s1467_s18 = smov [#allocation5]  }
  0xe7   : > { %p1356_p0 = scmp.ne.s32.totalorder %s354_s5, %s1355_s3  ;;  %s1360_s19 = sshll.u32 %s1467_s18, 4  ;;  %s1361_s19 = int_to_ptr.vmem [resolvable:$false] %s1360_s19 }
  0xe8   : > { %s1362_s23 = scalar_lea.vmem %s1361_s19, 256  ;;  %p1363_p10 = scmp.lt.s32.totalorder %s354_s5, %s1361_s19 }
  0xe9   : > { %p1358_p2 = pnand %p1356_p0, %p1312_p8  ;;  %p1364_p6 = scmp.lt.s32.totalorder %s1362_s23, %s1355_s3 }
  0xeb   : > { %p1359_p4 = pneg %p1358_p2  ;;  %p1365_p5 = por %p1364_p6, %p1363_p10 }
  0xed   : > { %p1366_p7 = pnand %p1365_p5, %p1359_p4 }
  0xef   : > { %1369 = shalt.err (!%p1366_p7)
}
  0xf0   : > { %1070 = dma.hbm_to_vmem [thread:$0]  (!%p1755_p11), %s1762_s13, 128, %s354_s5, %s343_s26  }
  0xf1   : > { %p1945_p3 = scmp.ne.s32.totalorder %s1930_s12, 0 }
  0xf2   : > { %s1815_s24 = sand.u32 (!%p1945_p3), 1, %s1448_s28   ;;  %p1946_p6 = scmp.ne.s32.totalorder (!%p1945_p3), %s1941_s22, 0 }
  0xf3   : > { %362 = sbr.rel (%p1945_p3) target bundleno = 1229 (0x4cd), region = 52  ;;  %s1818_s4 = sshll.u32 (!%p1945_p3), %s1815_s24, 3 }
  0xf4   : > { %s365_s21 = scalar_lea.sflag (!%p1945_p3), [#allocation3], %s1815_s24  ;;  %s368_s2 = scalar_lea.vmem (!%p1945_p3), [#allocation2], %s1818_s4 }
  0xfa   : > { %1415 = dma.done.wait (%p1946_p6), %s365_s21, 128  }
  0xfb   : > { %1417 = vsyncadd (%p1946_p6), %s365_s21, 4294967168  ;;  %s373_s12 = sand.u32 1, %s1542_s11   ;;  %s377_s13 = scalar_lea.vmem [#allocation5], %s1818_s4 }
  0xfc   : > { %s374_s9 = scalar_lea.sflag [#allocation6], %s373_s12 }
  0xfd   : > { %1419 = dma.done.wait (%p1946_p6), %s374_s9, 128  }
  0xfe   : > { %1421 = vsyncadd (%p1946_p6), %s374_s9, 4294967168  ;;  %p1947_p11 = scmp.eq.s32.totalorder %s1542_s11, 0 }
 0x100   : > { %1423 = dma.done.wait (%p1947_p11), [#allocation6], 256   ;;  %p1948_p8 = pmov %p1947_p11 }
 0x102   : > { %1425 = vsyncadd (%p1948_p8), [#allocation6], 4294967040  ;;  %p1949_p9 = pmov %p1948_p8 }
 0x103   : > { %p1950_p12 = pmov %p1948_p8 }
 0x104   : > { %1427 = dma.done.wait (%p1949_p9), [#allocation9], 528  }
 0x105   : > { %1429 = vsyncadd (%p1950_p12), [#allocation9], 4294966768  ;;  %p1951_p1 = pmov %p1948_p8 }
 0x107   : > { %1431 = dma.done.wait (%p1951_p1), [#allocation12], 528   ;;  %p1952_p13 = pmov %p1951_p1 }
 0x108   : > { %p1953_p0 = pmov %p1951_p1 }
 0x109   : > { %1433 = vsyncadd (%p1952_p13), [#allocation12], 4294966768 }
 0x10a   : > { %1435 = dma.done.wait (%p1953_p0), [#allocation15], 16   ;;  %p1954_p2 = pmov %p1953_p0 }
 0x10b   : > { %v1468_v0 = vmov 0.0|0.0   ;;  %vm1469_vm0 = vmmov 0   ;;  %v1470_v1 = vmov 0.0   ;;  %v440_v2 = vld [vmem:[#allocation7] sm:$0xff]  ;;  %v441_v3 = vld [vmem:[#allocation7 + $0x8] sm:$0xff]  ;;  %v524_v5 = vld [vmem:[#allocation10] sm:$0xff]  ;;  %v694_v38 = vlaneseq }
 0x10c   : > { %1437 = vsyncadd (%p1954_p2), [#allocation15], 4294967280  ;;  %1000 = vmatprep.subr.bf16.mxu0 %v1468_v0  ;;  %975 = vmatprep.mubr.msk.f32.mxu0 %vm1469_vm0, %v1470_v1  ;;  %v1001_v4 = vpack.c.bf16 %v441_v3, %v440_v2  ;;  %v525_v6 = vld [vmem:[#allocation10 + $0x8] sm:$0xff]  ;;  %vm449_vm1 = vcmask 130048   ;;  %v526_v9 = vld [vmem:[#allocation10 + $0x10] sm:$0xff]  ;;  %vm535_vm2 = vcmask 261120  }
 0x10d   : > { %1003 = vmatprep.subr.bf16.mxu1 %v1468_v0  ;;  %986 = vmatprep.mubr.msk.f32.mxu1 %vm1469_vm0, %v1470_v1  ;;  %v1004_v7 = vpack.c.bf16 %v525_v6, %v524_v5  ;;  %v439_v8 = vld [vmem:[%s368_s2] sm:$0xff]  ;;  %v610_v12 = vld [vmem:[#allocation13] sm:$0xff]  ;;  %v948_v15 = vld [vmem:[#allocation8] ss:$0 sm:$0xff]  ;;  %v695_v42 = vand.u32 127, %v694_v38  ;;  %s1471_s22 = smov 16  }
 0x10e   : > { %1002 = vmatpush3.bf16.msra.mxu0 %v1001_v4  ;;  %v527_v10 = vld [vmem:[#allocation10 + $0x18] sm:$0xff]  ;;  %v611_v13 = vld [vmem:[#allocation13 + $0x8] sm:$0xff]  ;;  %v950_v23 = vld [vmem:[#allocation11] ss:$0 sm:$0xff]  ;;  %s1472_s5 = smov 32   ;;  %s1473_s26 = smov 112  }
 0x10f   : > { %1005 = vmatpush3.bf16.msra.mxu1 %v1004_v7  ;;  %1009 = vmatprep.subr.bf16.mxu0 %v1468_v0  ;;  %v1007_v11 = vpack.c.bf16 %v527_v10, %v526_v9  ;;  %v1010_v14 = vpack.c.bf16 %v611_v13, %v610_v12  ;;  %v612_v20 = vld [vmem:[#allocation13 + $0x10] sm:$0xff]  ;;  %v613_v21 = vld [vmem:[#allocation13 + $0x18] sm:$0xff]  ;;  %v952_v28 = vld [vmem:[#allocation14] ss:$0 sm:$0xff]  ;;  %vm696_vm4 = vcmp.lt.s32.totalorder %v695_v42, 16  ;;  %s1474_s10 = smov 48  }
 0x110   : > { %1006 = vmatprep.subr.bf16.mxu1 %v1468_v0  ;;  %v1013_v22 = vpack.c.bf16 %v613_v21, %v612_v20  ;;  %vm736_vm8 = vcmask 392192   ;;  %v723_v61 = vld [vmem:[%s377_s13] sm:$0xff]  ;;  %s955_s17 = sshll.u32 %s1542_s11, 7  ;;  %s438_s20 = scalar_lea.vmem [#allocation16], %s1818_s4  ;;  %vm758_vm9 = vcmask 785408  }
 0x111   : > { %976 = vmatmul.mubr.msk.f32.vlgmr.msra.gmra.mrb[0].mxu0 %vm449_vm1, %v439_v8  ;;  %s775_s6 = sshll.u32 %s438_s20, 4  ;;  %s1866_s19 = scalar_lea.hbm %s1918_s8, %s955_s17  ;;  %s1868_s6 = int_to_ptr.vmem [resolvable:$true] %s775_s6 }
 0x112   : > { %997 = vmatprep.mubr.msk.f32.mxu0 %vm1469_vm0, %v1470_v1  ;;  %1011 = vmatpush3.bf16.msra.mxu0 %v1010_v14  ;;  %s762_s23 = scalar_lea.sflag [#allocation4], %s1815_s24  ;;  %s1370_s11 = scalar_lea.vmem %s1868_s6, 128 }
 0x113   : > { %1008 = vmatpush3.bf16.msra.mxu1 %v1007_v11  ;;  %1012 = vmatprep.subr.bf16.mxu0 %v1468_v0  ;;  %p1371_p4 = scmp.ne.s32.totalorder %s1868_s6, %s1370_s11  ;;  %p1955_p10 = scmp.ne.s32.totalorder %s1942_s14, 0 }
 0x114   : > { %s1475_s4 = smov [#allocation16]  }
 0x115   : > { %p1372_p5 = pnand %p1371_p4, %p1955_p10  ;;  %s1374_s21 = sshll.u32 %s1475_s4, 4  ;;  %s1375_s21 = int_to_ptr.vmem [resolvable:$false] %s1374_s21 }
 0x116   : > { %1014 = vmatpush3.bf16.msra.mxu0 %v1013_v22  ;;  %s1376_s2 = scalar_lea.vmem %s1375_s21, 256  ;;  %p1377_p3 = scmp.lt.s32.totalorder %s1868_s6, %s1375_s21 }
 0x117   : > { %p1373_p7 = pneg %p1372_p5  ;;  %p1378_p6 = scmp.lt.s32.totalorder %s1376_s2, %s1370_s11 }
 0x119   : > { %p1379_p11 = por %p1378_p6, %p1377_p3 }
 0x11b   : > { %p1380_p8 = pnand %p1379_p11, %p1373_p7 }
 0x1e4   : > { %v519_v16 = vpop.f32.mrb[0].mxu0 }
 0x1e5   : > { %v520_v17 = vadd.f32 %v948_v15, %v519_v16  ;;  %v977_v18 = vpop.f32.mrb[1].mxu0 }
 0x1e7   : > { %v523_v19 = vmax.f32 %v520_v17, 0.0 }
 0x1e9   : > { %987 = vmatmul.mubr.msk.f32.vlgmr.msra.gmra.mrb[0].mxu1 %vm535_vm2, %v523_v19 }
 0x2bc   : > { %v605_v24 = vpop.f32.mrb[0].mxu1 }
 0x2bd   : > { %v606_v25 = vadd.f32 %v950_v23, %v605_v24  ;;  %v988_v26 = vpop.f32.mrb[1].mxu1 }
 0x2bf   : > { %v609_v27 = vmax.f32 %v606_v25, 0.0 }
 0x2c1   : > { %998 = vmatmul.mubr.msk.f32.vlgmr.msra.gmra.mrb[2].mxu0 %vm535_vm2, %v609_v27 }
 0x394   : > { %v690_v29 = vpop.f32.mrb[2].mxu0 }
 0x395   : > { %v691_v30 = vadd.f32 %v952_v28, %v690_v29  ;;  %v999_v31 = vpop.f32.mrb[3].mxu0 }
 0x397   : > { %v700_v32 = vand.u32 2147483647, %v691_v30  ;;  %v697_v45 = vmax.f32 %v691_v30, 0.0  ;;  %vm698_vm5 = vcmp.ne.f32.partialorder %v691_v30, %v691_v30 }
 0x399   : > { %v701_v33 = vsub.f32 0.0, %v700_v32 }
 0x39b   : > { %v702_v34 = vmul.f32 1.442695, %v701_v33 }
 0x39d   : > { %1136 = vpow2.f32 %v702_v34 }
 0x3a7   : > { %v1137_v35 = vpop.eup %1136 }
 0x3a8   : > { %v704_v36 = vadd.f32 1.0, %v1137_v35  ;;  %v707_v37 = vmul.f32 -0.5, %v1137_v35  ;;  %v710_v40 = vand.u32 2147483647, %v1137_v35 }
 0x3aa   : > { %1138 = vlog2.f32 %v704_v36  ;;  %v708_v39 = vadd.f32 1.0, %v707_v37  ;;  %vm711_vm3 = vcmp.lt.f32.partialorder %v710_v40, 0.0004427343 }
 0x3ac   : > { %v709_v44 = vmul.f32 %v1137_v35, %v708_v39 }
 0x3b4   : > { %v1139_v41 = vpop.eup %1138 }
 0x3b5   : > { %v706_v43 = vmul.f32 0.6931472, %v1139_v41 }
 0x3b7   : > { %v712_v46 = vsel %vm711_vm3, %v709_v44, %v706_v43 }
 0x3b8   : > { %v713_v47 = vadd.f32 %v712_v46, %v697_v45 }
 0x3ba   : > { %v714_v48 = vsel %vm698_vm5, %v691_v30, %v713_v47 }
 0x3bb   : > { %v715_v49 = vsel %vm696_vm4, %v691_v30, %v714_v48 }
 0x3bc   : > { %740 = vrot.lane.b32.xlu1 %v715_v49, %s1471_s22  ;;  %1140 = vrsqrt.f32 %v715_v49  ;;  %vm718_vm6 = vcmp.eq.f32.partialorder %v715_v49, inf  ;;  %v721_v52 = vand.u32 2147483648, %v715_v49  ;;  %vm720_vm7 = vcmp.eq.f32.partialorder %v715_v49, 0.0 }
 0x3c6   : > { %v1141_v50 = vpop.eup %1140 }
 0x3c7   : > { %v717_v51 = vmul.f32 %v1141_v50, %v715_v49 }
 0x3c9   : > { %v719_v53 = vsel %vm718_vm6, %v715_v49, %v717_v51 }
 0x3ca   : > { %v722_v54 = vsel %vm720_vm7, %v721_v52, %v719_v53 }
 0x3cb   : > { %731 = vrot.lane.b32.xlu1 %v722_v54, %s1472_s5  ;;  %725 = vrot.lane.b32.xlu0 %v722_v54, %s1473_s26 }
 0x3cf   : > { %746 = vrot.lane.b32.xlu1 %v715_v49, %s1474_s10  ;;  %728 = vrot.lane.b32.xlu0 %v722_v54, %s1471_s22 }
 0x3d3   : > { %743 = vrot.lane.b32.xlu0 %v715_v49, %s1472_s5 }
 0x42e   : > { %v741_v55 = vpop.permute.xlu1 %740 }
 0x42f   : > { %v749_v63 = vsel %vm449_vm1, %v715_v49, %v741_v55 }
 0x43d   : > { %v726_v56 = vpop.permute.xlu0 %725  ;;  %v732_v57 = vpop.permute.xlu1 %731 }
 0x43e   : > { %v734_v58 = vsel %vm449_vm1, %v726_v56, %v722_v54 }
 0x441   : > { %v729_v59 = vpop.permute.xlu0 %728  ;;  %v747_v1 = vpop.permute.xlu1 %746 }
 0x442   : > { %v735_v60 = vsel %vm535_vm2, %v734_v58, %v729_v59 }
 0x443   : > { %v737_v62 = vsel %vm736_vm8, %v735_v60, %v732_v57 }
 0x444   : > { %v738_v2 = vmul.f32 %v737_v62, %v723_v61 }
 0x445   : > { %v744_v0 = vpop.permute.xlu0 %743 }
 0x446   : > { %v750_v3 = vsel %vm535_vm2, %v749_v63, %v744_v0 }
 0x447   : > { %v751_v4 = vsel %vm736_vm8, %v750_v3, %v747_v1 }
 0x448   : > { %v752_v5 = vadd.f32 %v751_v4, %v738_v2 }
 0x44a   : > { %754 = vrot.lane.b32.xlu0 %v752_v5, %s1472_s5 }
 0x4bc   : > { %v755_v6 = vpop.permute.xlu0 %754 }
 0x4bd   : > { %v757_v7 = vsel %vm535_vm2, %v715_v49, %v755_v6 }
 0x4be   : > { %v759_v8 = vsel %vm758_vm9, %v757_v7, 0.0 }
 0x4bf   : > { %760 = vst [vmem:[%s438_s20] sm:$0xff] %v759_v8 }
 0x4c0   : > { %1383 = shalt.err (!%p1380_p8)
}
 0x4c1   : > { %s1384_s24 = scalar_lea.hbm %s1866_s19, 128  ;;  %s1388_s13 = scalar_lea.hbm %s1918_s8, 256 }
 0x4c2   : > { %p1385_p9 = scmp.ne.s32.totalorder %s1866_s19, %s1384_s24  ;;  %p1389_p13 = scmp.lt.u32.totalorder %s1866_s19, %s1918_s8 }
 0x4c3   : > { %p1390_p0 = scmp.lt.u32.totalorder %s1388_s13, %s1384_s24  ;;  %p1392_p4 = scmp.lt.u32.totalorder %s1384_s24, %s1866_s19 }
 0x4c4   : > { %p1386_p12 = pnand %p1385_p9, %p1955_p10 }
 0x4c5   : > { %p1391_p2 = por %p1390_p0, %p1389_p13 }
 0x4c6   : > { %p1387_p1 = pneg %p1386_p12 }
 0x4c7   : > { %p1393_p5 = por %p1392_p4, %p1391_p2 }
 0x4c9   : > { %p1394_p7 = pnand %p1393_p5, %p1387_p1 }
 0x4cb   : > { %1397 = shalt.err (!%p1394_p7)
}
 0x4cc   : > { %1043 = dma.vmem_to_hbm [thread:$0]  (%p1955_p10), %s1868_s6, 128, %s1866_s19, %s762_s23  }
 0x4cd PF: > { %s787_s26 = sand.u32 1, %s1444_s27   ;;  %p1956_p3 = scmp.ne.s32.totalorder %s1943_s16, 0 }
 0x4ce   : > { %p1957_p6 = scmp.ge.s32.totalorder %s1456_s30, 2  ;;  %s788_s10 = scalar_lea.sflag [#allocation4], %s787_s26 }
 0x4d0   : > { %p1072_p11 = pnand %p1957_p6, %p1956_p3 }
 0x4d2   : > { %1439 = dma.done.wait (!%p1072_p11), %s788_s10, 128  }
 0x4d3   : > { %1441 = vsyncadd (!%p1072_p11), %s788_s10, 4294967168  ;;  %p27_p8 = scmp.ge.s32.totalorder %s1708_s15, 4   ;;  %s1958_s27 = smov %s1448_s28 }
 0x4d4   : > { %s1959_s28 = smov %s1452_s29  ;;  %s1960_s29 = smov %s1719_s25 }
 0x4d5   : > { %s1961_s30 = smov %s1708_s15  ;;  %29 = sbr.rel (!%p27_p8) target bundleno = 16 (0x10), region = 134 }
 0x4dc   :  { %793 = vsyncpa [#allocation3], 1 }
 0x4dd   :  { %795 = vsyncpa [#allocation3 + $0x1], 1 }
 0x4de   :  { %796 = vsyncpa [#allocation6], 1 }
 0x4df   :  { %798 = vsyncpa [#allocation6 + $0x1], 1 }
 0x4e0   :  { %799 = vsyncpa [#allocation9], 1 }
 0x4e1   :  { %800 = vsyncpa [#allocation12], 1 }
 0x4e2   :  { %801 = vsyncpa [#allocation15], 1 }
 0x4e3   :  { %802 = vsyncpa [#allocation4], 1 }
 0x4e4   :  { %804 = vsyncpa [#allocation4 + $0x1], 1 }

</bundles_post_ra>
